<compile_context>
chip_gen: v7x
topology: tpu7x:2x2x1
jax: 0.10.0
libtpu: 0.0.40
codegen_flags: <defaults>
</compile_context>

<pallas_src>
import math

import jax
import jax.numpy as jnp
from jax.experimental import pallas as pl
from jax.experimental.pallas import tpu as pltpu


def calculate_laplacian_with_self_loop(adj):
    """Plain-JAX glue: symmetric-normalized adjacency with self loops."""
    adj = adj.astype(jnp.float32)
    n = adj.shape[0]
    a_hat = adj + jnp.eye(n, dtype=jnp.float32)
    deg = jnp.sum(a_hat, axis=1)
    d_inv_sqrt = jnp.diag(deg ** -0.5)
    return d_inv_sqrt @ a_hat @ d_inv_sqrt


def _round_up(x, m):
    return ((x + m - 1) // m) * m


def _choose_tiling(num_nodes):
    """Pick (tile_n, n_pad): row tile of L and the padded node count.

    * num_nodes <= 1024: split into TWO equal multiple-of-8 row tiles so the
      grid has >= 2 steps (keeps both v7x TensorCores busy, enables pipelining).
    * larger graphs: biggest tile in {1024, 512, 256, 128} whose two
      double-buffered bf16 L tiles stay within a conservative (v7x-safe)
      ~24 MiB budget.  Never falls back to tile_n = N or tile_n = 8.
    """
    if num_nodes <= 1024:
        tile = max(8, _round_up(pl.cdiv(num_nodes, 2), 8))
        return tile, 2 * tile
    for tile in (1024, 512, 256, 128):
        n_pad = _round_up(num_nodes, tile)
        if 2 * tile * n_pad * 2 <= 24 * 1024 * 1024:  # 2 bufs x bf16 L tile
            return tile, n_pad
    tile = 128
    return tile, _round_up(num_nodes, tile)


def _vmem_limit_bytes(tile_n, n_pad, bo_pad):
    """Scoped-VMEM cap derived from actual buffer sizes, with 2x headroom,
    clamped to [32 MiB, 64 MiB] (64 MiB = v7x physical, safe everywhere)."""
    l_buf = tile_n * n_pad * 2          # bf16 L row tile
    cw2_buf = n_pad * bo_pad * 2        # bf16 CW2 (resident, constant index)
    out_buf = tile_n * bo_pad * 4       # f32 output tile
    bias_buf = bo_pad * 4
    est = 2 * (l_buf + cw2_buf + out_buf + bias_buf)   # double-buffer worst case
    return int(min(max(2 * est, 32 * 1024 * 1024), 64 * 1024 * 1024))


def _lap_matmul_kernel(lap_ref, cw2_ref, bias_ref, out_ref):
    # Single wide, lane-dense MXU matmul + f32 bias epilogue.
    out_ref[...] = jnp.dot(lap_ref[...], cw2_ref[...],
                           preferred_element_type=jnp.float32) + bias_ref[...]


def tgcn_graph_convolution(inputs, hidden_state, laplacian, weights, biases,
                           num_gru_units, output_dim):
    """
    inputs:       (B, N)            float32
    hidden_state: (B, N*H) or (B, N, H)
    laplacian:    (N, N)
    weights:      (H+1, O)
    biases:       (O,)
    returns:      (B, N*O)          float32
    """
    batch_size, num_nodes = inputs.shape
    h = num_gru_units
    o = output_dim
    bo = batch_size * o

    # ---- Stage 1 (hoisted, plain XLA, f32): CW = [x | h] @ W without the concat.
    hidden2 = hidden_state.reshape(batch_size * num_nodes, h).astype(jnp.float32)
    x2 = inputs.reshape(batch_size * num_nodes, 1).astype(jnp.float32)
    cw = hidden2 @ weights[1:, :].astype(jnp.float32) \
        + x2 * weights[0:1, :].astype(jnp.float32)                  # (B*N, O) f32
    # Repack to (N, B*O): column index = b*O + o  (layout plumbing, tiny vs L reads).
    cw2 = jnp.transpose(cw.reshape(batch_size, num_nodes, o),
                        (1, 0, 2)).reshape(num_nodes, bo)

    # ---- Padding for lane-dense output and clean row tiling.
    tile_n, n_pad = _choose_tiling(num_nodes)
    bo_pad = max(128, _round_up(bo, 128))
    grid = (n_pad // tile_n,)

    lap_p = jnp.pad(laplacian.astype(jnp.float32),
                    ((0, n_pad - num_nodes), (0, n_pad - num_nodes))
                    ).astype(jnp.bfloat16)                           # (n_pad, n_pad)
    cw2_p = jnp.pad(cw2, ((0, n_pad - num_nodes), (0, bo_pad - bo))
                    ).astype(jnp.bfloat16)                           # (n_pad, bo_pad)
    bias_tiled = jnp.tile(biases.reshape(1, o).astype(jnp.float32), (1, batch_size))
    bias_p = jnp.pad(bias_tiled, ((0, 0), (0, bo_pad - bo)))         # (1, bo_pad)

    # ---- Stage 2 kernel: out_tile = L_tile @ CW2 + bias   (HBM-bound on L).
    out_pad = pl.pallas_call(
        _lap_matmul_kernel,
        out_shape=jax.ShapeDtypeStruct((n_pad, bo_pad), jnp.float32),
        grid_spec=pltpu.PrefetchScalarGridSpec(
            num_scalar_prefetch=0,
            grid=grid,
            in_specs=[
                pl.BlockSpec((tile_n, n_pad), lambda i: (i, 0)),   # L row tile
                pl.BlockSpec((n_pad, bo_pad), lambda i: (0, 0)),   # CW2 (resident)
                pl.BlockSpec((1, bo_pad), lambda i: (0, 0)),       # bias (resident)
            ],
            out_specs=pl.BlockSpec((tile_n, bo_pad), lambda i: (i, 0)),
        ),
        compiler_params=pltpu.CompilerParams(
            # Independent row tiles -> shard across v7x's two TensorCores.
            dimension_semantics=("parallel",),
            vmem_limit_bytes=_vmem_limit_bytes(tile_n, n_pad, bo_pad),
        ),
    )(lap_p, cw2_p, bias_p)

    # ---- Unpad + (N, B*O) -> (B, N*O) layout plumbing on the small output.
    out_nbo = out_pad[:num_nodes, :bo]
    out = jnp.transpose(out_nbo.reshape(num_nodes, batch_size, o), (1, 0, 2))
    return out.reshape(batch_size, num_nodes * o)


def _xavier_uniform(key, shape, dtype=jnp.float32):
    fan_in, fan_out = shape[0], shape[1]
    bound = math.sqrt(6.0 / (fan_in + fan_out))
    return jax.random.uniform(key, shape, dtype, minval=-bound, maxval=bound)


def _reference(inputs, hidden_state, laplacian, weights, biases, h, o):
    """Pure-JAX (f32) transcription of the PyTorch forward, for verification."""
    b, n = inputs.shape
    x = inputs.reshape((b, n, 1))
    hs = hidden_state.reshape((b, n, h))
    cat = jnp.concatenate([x, hs], axis=2)                    # (B, N, H+1)
    cat = jnp.transpose(cat, (1, 2, 0)).reshape((n, (h + 1) * b))
    a_cat = laplacian @ cat
    a_cat = a_cat.reshape((n, h + 1, b))
    a_cat = jnp.transpose(a_cat, (2, 0, 1)).reshape((b * n, h + 1))
    out = a_cat @ weights + biases
    return out.reshape((b, n * o))


if __name__ == "__main__":
    batch_size = 2
    num_nodes = 16
    num_gru_units = 32
    output_dim = 8
    bias_init = 0.0

    key = jax.random.PRNGKey(0)
    k_adj, k_w, k_in, k_hid = jax.random.split(key, 4)

    # Deterministic synthetic adjacency (symmetric, non-negative).
    adj_raw = jax.random.uniform(k_adj, (num_nodes, num_nodes), jnp.float32)
    adj = (adj_raw + adj_raw.T) * 0.5
    laplacian = calculate_laplacian_with_self_loop(adj)

    # Parameters (xavier_uniform weights, constant bias), as in reset_parameters.
    weights = _xavier_uniform(k_w, (num_gru_units + 1, output_dim))
    biases = jnp.full((output_dim,), bias_init, dtype=jnp.float32)

    # Forward inputs.
    inputs = jax.random.normal(k_in, (batch_size, num_nodes), jnp.float32)
    hidden_state = jax.random.normal(
        k_hid, (batch_size, num_nodes * num_gru_units), jnp.float32)

    out = tgcn_graph_convolution(inputs, hidden_state, laplacian, weights,
                                 biases, num_gru_units, output_dim)
    out = jax.block_until_ready(out)

    ref = _reference(inputs, hidden_state, laplacian, weights, biases,
                     num_gru_units, output_dim)
    assert out.shape == (batch_size, num_nodes * output_dim)
    # bf16 MXU inputs with f32 accumulation -> small rounding vs f32 reference.
    assert jnp.allclose(out, ref, atol=2e-2, rtol=2e-2), \
        float(jnp.max(jnp.abs(out - ref)))

    print("KERNEL_OK")
</pallas_src>

<mosaic_0001>
module attributes {stable_mosaic.version = 11 : i64} {
  func.func @_lap_matmul_kernel(%arg0: i32, %arg1: memref<8x16xbf16, #tpu.memory_space<vmem>>, %arg2: memref<16x128xbf16, #tpu.memory_space<vmem>>, %arg3: memref<1x128xf32, #tpu.memory_space<vmem>>, %arg4: memref<8x128xf32, #tpu.memory_space<vmem>>) attributes {dimension_semantics = [#tpu.dimension_semantics<parallel>], iteration_bounds = array<i64: 2>, scalar_prefetch = 0 : i64, scratch_operands = 0 : i64, tpu.core_type = #tpu.core_type<tc>, window_params = [{transform_indices = @transform_0, window_bounds = array<i64: 8, 16>}, {pipeline_mode = #tpu.pipeline_mode<synchronous>, transform_indices = @transform_1, window_bounds = array<i64: 16, 128>}, {pipeline_mode = #tpu.pipeline_mode<synchronous>, transform_indices = @transform_2, window_bounds = array<i64: 1, 128>}, {transform_indices = @transform_3, window_bounds = array<i64: 8, 128>}]} {
    %c0 = arith.constant 0 : index
    %c0_0 = arith.constant 0 : index
    %0 = vector.load %arg1[%c0, %c0_0] : memref<8x16xbf16, #tpu.memory_space<vmem>>, vector<8x16xbf16>
    %c0_1 = arith.constant 0 : index
    %c0_2 = arith.constant 0 : index
    %1 = vector.load %arg2[%c0_1, %c0_2] : memref<16x128xbf16, #tpu.memory_space<vmem>>, vector<16x128xbf16>
    %cst = arith.constant dense<0.000000e+00> : vector<8x128xf32>
    %2 = tpu.matmul %0, %1, %cst {dimension_numbers = #tpu.dot_dimension_numbers<[1], [0], [0], [1], [0, 0, 1, 1], [], []>} : vector<8x16xbf16>, vector<16x128xbf16>, vector<8x128xf32> -> vector<8x128xf32>
    %c0_3 = arith.constant 0 : index
    %c0_4 = arith.constant 0 : index
    %3 = vector.load %arg3[%c0_3, %c0_4] : memref<1x128xf32, #tpu.memory_space<vmem>>, vector<1x128xf32>
    %4 = vector.broadcast %3 : vector<1x128xf32> to vector<8x128xf32>
    %5 = arith.addf %2, %4 : vector<8x128xf32>
    %c0_5 = arith.constant 0 : index
    %c0_6 = arith.constant 0 : index
    %6 = vector.load %arg4[%c0_5, %c0_6] : memref<8x128xf32, #tpu.memory_space<vmem>>, vector<8x128xf32>
    tpu.vector_store %arg4[%c0_5, %c0_6], %5 {strides = array<i32>} : memref<8x128xf32, #tpu.memory_space<vmem>>, vector<8x128xf32>,
    return
  }
  func.func @transform_0(%arg0: i32) -> (i32, i32) {
    %c0_i32 = arith.constant 0 : i32
    %c0_i32_0 = arith.constant 0 : i32
    return %arg0, %c0_i32 : i32, i32
  }
  func.func @transform_1(%arg0: i32) -> (i32, i32) {
    %c0_i32 = arith.constant 0 : i32
    %c0_i32_0 = arith.constant 0 : i32
    %c0_i32_1 = arith.constant 0 : i32
    return %c0_i32, %c0_i32_0 : i32, i32
  }
  func.func @transform_2(%arg0: i32) -> (i32, i32) {
    %c0_i32 = arith.constant 0 : i32
    %c0_i32_0 = arith.constant 0 : i32
    %c0_i32_1 = arith.constant 0 : i32
    return %c0_i32, %c0_i32_0 : i32, i32
  }
  func.func @transform_3(%arg0: i32) -> (i32, i32) {
    %c0_i32 = arith.constant 0 : i32
    %c0_i32_0 = arith.constant 0 : i32
    return %arg0, %c0_i32 : i32, i32
  }
}

</mosaic_0001>

<bundles_post_ra>
// kernel: tpu_custom_call.1
= control target key start
LH: loop header
LB: loop body
LE: loop exit
PB: predicated region body
PF: predicated region fallthrough
CT: control target
= control target key end

     0   :  { %8 = vsyncpa [#allocation3], 0  ;;  %s801_s0 = inlined_call_operand.hbm [shape: bf16[16,16], index: 0, kind: input, shape index: {}]   ;;  %s802_s1 = inlined_call_operand.hbm [shape: bf16[16,128], index: 1, kind: input, shape index: {}]   ;;  %s803_s2 = inlined_call_operand.vmem [shape: f32[1,128], index: 2, kind: input, shape index: {}]   ;;  %s804_s3 = inlined_call_operand.hbm [shape: f32[16,128], index: 3, kind: output, shape index: {}]  }
   0x1   :  { %10 = vsyncpa [#allocation3 + $0x1], 0 }
   0x2   :  { %11 = vsyncpa [#allocation6], 0 }
   0x3   :  { %12 = vsyncpa [#allocation4], 0 }
   0x4   :  { %14 = vsyncpa [#allocation4 + $0x1], 0  ;;  %s601_s12 = smov 0   ;;  %s603_s13 = smov 0  }
   0x5   :  { %s605_s14 = smov 0   ;;  %s607_s15 = smov 0  }
   0x6 LB: > { %s622_s16 = sadd.s32 4294967295, %s572_s15   ;;  %s357_s17 = sadd.s32 4294967294, %s572_s15   ;;  %s572_s15 = sphi %s607_s15, %s824_s15   ;;  %s568_s14 = sphi %s605_s14, %s823_s14   ;;  %s564_s13 = sphi %s603_s13, %s822_s13   ;;  %s560_s12 = sphi %s601_s12, %s821_s12  }
   0x7   : > { %p40_p0 = scmp.ne.s32.totalorder %s564_s13, %s560_s12  ;;  %p805_p1 = scmp.eq.s32.totalorder %s622_s16, 0 }
   0x8   : > { %p112_p3 = scmp.eq.s32.totalorder %s357_s17, 1  ;;  %p358_p5 = scmp.ge.s32.totalorder %s572_s15, 1 }
   0x9   : > { %p631_p4 = por %p805_p1, %p40_p0  ;;  %p119_p7 = scmp.lt.s32.totalorder %s572_s15, 3 }
   0xa   : > { %p636_p6 = por %p112_p3, %p40_p0  ;;  %s574_s21 = smov [#allocation5]  }
   0xb   : > { %s808_s18 = scalar_select %p631_p4, 1, 0 }
   0xc   : > { %s809_s19 = scalar_select %p636_p6, 1, 0 }
   0xd   : > { %p641_p8 = pnand %p358_p5, %p119_p7  ;;  %s131_s22 = sshll.u32 %s574_s21, 4  ;;  %s645_s22 = int_to_ptr.vmem [resolvable:$true] %s131_s22 }
   0xe   : > { %s657_s24 = sadd.s32 1, %s572_s15   ;;  %s27_s25 = sadd.s32 1, %s568_s14 }
   0xf   : > { %s810_s20 = scalar_select %p641_p8, 1, 0 }
  0x10   : > { %p390_p9 = pneg %p641_p8  ;;  %s24_s26 = ssub.s32 %s572_s15, %s657_s24 }
  0x11   : > { %s444_s29 = scalar_lea.hbm %s802_s1, 128 }
  0x12   : > { %p652_p11 = pnand %p390_p9, %p805_p1  ;;  %p445_p12 = scmp.ne.s32.totalorder %s802_s1, %s444_s29 }
  0x13   : > { %p451_p5 = scmp.lt.u32.totalorder %s444_s29, %s802_s1 }
  0x14   : > { %p446_p13 = pneg %p652_p11 }
  0x16   : > { %p447_p0 = pnand %p446_p13, %p445_p12 }
  0x18   : > { %p448_p3 = pneg %p447_p0 }
  0x1a   : > { %p453_p7 = pnand %p451_p5, %p448_p3 }
  0x1c   : > { %456 = shalt.err (!%p453_p7)
}
  0x1d   : > { %s457_s7 = scalar_lea.vmem %s645_s22, 128  ;;  %p465_p2 = scmp.lt.s32.totalorder %s645_s22, %s645_s22 }
  0x1e   : > { %p458_p9 = scmp.ne.s32.totalorder %s645_s22, %s457_s7  ;;  %p466_p6 = scmp.lt.s32.totalorder %s457_s7, %s457_s7 }
  0x20   : > { %p460_p10 = pnand %p458_p9, %p446_p13  ;;  %p467_p4 = por %p466_p6, %p465_p2 }
  0x22   : > { %p461_p1 = pneg %p460_p10 }
  0x24   : > { %p468_p8 = pnand %p467_p4, %p461_p1 }
  0x26   : > { %471 = shalt.err (!%p468_p8)
}
  0x27   : > { %s575_s8 = smov 64   ;;  %s576_s9 = smov 4  }
  0x28   : > { %393 = dma.hbm_to_vmem [thread:$0]  (!%p652_p11), %s802_s1, 128, %s645_s22, [#allocation6], %s575_s8, %s575_s8, %s576_s9  }
  0x29   : > { %p25_p2 = scmp.eq.s32.totalorder %s24_s26, 0  ;;  %p34_p1 = scmp.ne.s32.totalorder %s568_s14, %s564_s13 }
  0x2a   : > { %p35_p4 = scmp.eq.s32.totalorder %s572_s15, 0  ;;  %p403_p6 = scmp.lt.s32.totalorder %s572_s15, 2 }
  0x2b   : > { %s688_s17 = scalar_select %p25_p2, %s568_s14, %s27_s25  }
  0x2c   : > { %p36_p8 = por %p35_p4, %p34_p1  ;;  %p812_p10 = scmp.eq.s32.totalorder %s622_s16, 1 }
  0x2d   : > { %s148_s27 = sand.u32 1, %s568_s14   ;;  %s362_s28 = sshll.u32 %s572_s15, 6 }
  0x2e   : > { %p692_p12 = por %p812_p10, %p34_p1  ;;  %s361_s29 = sshll.u32 %s148_s27, 2 }
  0x2f   : > { %s701_s4 = scalar_lea.hbm %s801_s0, %s362_s28  ;;  %s152_s22 = scalar_lea.vmem [#allocation2], %s361_s29 }
  0x30   : > { %s159_s25 = sshll.u32 %s152_s22, 4  ;;  %p703_p11 = pnand %p403_p6, %p36_p8  ;;  %s707_s25 = int_to_ptr.vmem [resolvable:$true] %s159_s25 }
  0x31   : > { %s149_s5 = scalar_lea.sflag [#allocation3], %s148_s27  ;;  %s472_s6 = scalar_lea.hbm %s701_s4, 64 }
  0x32   : > { %p473_p13 = scmp.ne.s32.totalorder %s701_s4, %s472_s6  ;;  %p474_p0 = pneg %p703_p11 }
  0x33   : > { %s477_s9 = scalar_lea.hbm %s801_s0, 128  ;;  %p478_p7 = scmp.lt.u32.totalorder %s701_s4, %s801_s0 }
  0x34   : > { %p475_p3 = pnand %p474_p0, %p473_p13  ;;  %p479_p9 = scmp.lt.u32.totalorder %s477_s9, %s472_s6 }
  0x35   : > { %p481_p1 = scmp.lt.u32.totalorder %s472_s6, %s701_s4 }
  0x36   : > { %p476_p5 = pneg %p475_p3  ;;  %p480_p2 = por %p479_p9, %p478_p7 }
  0x38   : > { %p482_p4 = por %p481_p1, %p480_p2 }
  0x3a   : > { %p483_p6 = pnand %p482_p4, %p476_p5 }
  0x3c   : > { %486 = shalt.err (!%p483_p6)
}
  0x3d   : > { %s487_s27 = scalar_lea.vmem %s707_s25, 64  ;;  %s577_s28 = smov [#allocation2]  }
  0x3e   : > { %p488_p8 = scmp.ne.s32.totalorder %s707_s25, %s487_s27  ;;  %s492_s29 = sshll.u32 %s577_s28, 4  ;;  %s493_s29 = int_to_ptr.vmem [resolvable:$false] %s492_s29 }
  0x3f   : > { %s494_s23 = scalar_lea.vmem %s493_s29, 128  ;;  %p495_p3 = scmp.lt.s32.totalorder %s707_s25, %s493_s29 }
  0x40   : > { %p490_p10 = pnand %p488_p8, %p474_p0  ;;  %p496_p7 = scmp.lt.s32.totalorder %s494_s23, %s487_s27 }
  0x42   : > { %p491_p13 = pneg %p490_p10  ;;  %p497_p9 = por %p496_p7, %p495_p3 }
  0x44   : > { %p498_p2 = pnand %p497_p9, %p491_p13 }
  0x46   : > { %501 = shalt.err (!%p498_p2)
}
  0x47   : > { %397 = dma.hbm_to_vmem [thread:$0]  (!%p703_p11), %s701_s4, 64, %s707_s25, %s149_s5  }
  0x48   : > { %p815_p5 = scmp.ne.s32.totalorder %s810_s20, 0 }
  0x49   : > { %s737_s30 = sand.u32 (!%p815_p5), 1, %s564_s13   ;;  %p816_p0 = scmp.ne.s32.totalorder (!%p815_p5), %s808_s18, 0 }
  0x4a   : > { %168 = sbr.rel (%p815_p5) target bundleno = 318 (0x13e), region = 32  ;;  %s364_s22 = sshll.u32 (!%p815_p5), %s737_s30, 2 }
  0x4b   : > { %s171_s6 = scalar_lea.sflag (!%p815_p5), [#allocation3], %s737_s30  ;;  %s174_s7 = scalar_lea.vmem (!%p815_p5), [#allocation2], %s364_s22 }
  0x51   : > { %547 = dma.done.wait (%p816_p0), %s171_s6, 64  }
  0x52   : > { %549 = vsyncadd (%p816_p0), %s171_s6, 4294967232  ;;  %p817_p1 = scmp.eq.s32.totalorder %s622_s16, 0 }
  0x54   : > { %551 = dma.done.wait (%p817_p1), [#allocation6], 128   ;;  %p818_p11 = pmov %p817_p1 }
  0x55   : > { %v578_v0 = vmov 0.0   ;;  %vm579_vm0 = vmmov 0   ;;  %v443_v1 = vld [vmem:[#allocation5] sm:$0xff]   ;;  %v202_v2 = vld [vmem:[%s174_s7] sm:$0xf]  ;;  %vm218_vm1 = vcmask 130048  }
  0x56   : > { %553 = vsyncadd (%p818_p11), [#allocation6], 4294967168  ;;  %376 = vmatprep.subr.bf16.mxu0 %v578_v0  ;;  %378 = vmatprep.mubr.msk.bf16.mxu0 %vm579_vm0, %v578_v0  ;;  %s366_s18 = sshll.u32 %s737_s30, 3  ;;  %v367_v3 = vld [vmem:[%s803_s2] ss:$0 sm:$0xff]  ;;  %s371_s25 = sshll.u32 %s622_s16, 7 }
  0x57   : > { %377 = vmatpush3.bf16.msra.mxu0 %v443_v1  ;;  %s200_s26 = scalar_lea.vmem [#allocation7], %s366_s18  ;;  %s757_s10 = scalar_lea.hbm %s804_s3, %s371_s25 }
  0x58   : > { %s277_s5 = sshll.u32 %s200_s26, 4  ;;  %s264_s11 = scalar_lea.sflag [#allocation4], %s737_s30  ;;  %s759_s5 = int_to_ptr.vmem [resolvable:$true] %s277_s5 }
  0x59   : > { %s502_s16 = scalar_lea.vmem %s759_s5, 128  ;;  %s580_s27 = smov [#allocation7]  }
  0x5a   : > { %379 = vmatmul.mubr.msk.bf16.vlgmr.msra.gmra.mrb[0].mxu0 %vm218_vm1, %v202_v2  ;;  %p503_p4 = scmp.ne.s32.totalorder %s759_s5, %s502_s16  ;;  %s506_s28 = sshll.u32 %s580_s27, 4  ;;  %s507_s28 = int_to_ptr.vmem [resolvable:$false] %s506_s28 }
  0x5b   : > { %s508_s29 = scalar_lea.vmem %s507_s28, 256  ;;  %p509_p10 = scmp.lt.s32.totalorder %s759_s5, %s507_s28 }
  0x5c   : > { %p504_p6 = pnand %p503_p4, %p692_p12  ;;  %p510_p13 = scmp.lt.s32.totalorder %s508_s29, %s502_s16 }
  0x5e   : > { %p505_p8 = pneg %p504_p6  ;;  %p511_p3 = por %p510_p13, %p509_p10 }
  0x60   : > { %p512_p7 = pnand %p511_p3, %p505_p8 }
 0x12d   : > { %v256_v4 = vpop.f32.mrb[0].mxu0 }
 0x12e   : > { %v257_v5 = vadd.f32 %v367_v3, %v256_v4  ;;  %v380_v6 = vpop.f32.mrb[1].mxu0 }
 0x12f   : > { %v259_v7 = vpop.f32.mrb[2].mxu0 }
 0x130   : > { %262 = vst [vmem:[%s200_s26] sm:$0xff] %v257_v5  ;;  %v381_v8 = vpop.f32.mrb[3].mxu0 }
 0x131   : > { %515 = shalt.err (!%p512_p7)
}
 0x132   : > { %s516_s23 = scalar_lea.hbm %s757_s10, 128  ;;  %s520_s6 = scalar_lea.hbm %s804_s3, 256 }
 0x133   : > { %p517_p9 = scmp.ne.s32.totalorder %s757_s10, %s516_s23  ;;  %p521_p0 = scmp.lt.u32.totalorder %s757_s10, %s804_s3 }
 0x134   : > { %p522_p1 = scmp.lt.u32.totalorder %s520_s6, %s516_s23  ;;  %p524_p4 = scmp.lt.u32.totalorder %s516_s23, %s757_s10 }
 0x135   : > { %p518_p2 = pnand %p517_p9, %p692_p12 }
 0x136   : > { %p523_p11 = por %p522_p1, %p521_p0 }
 0x137   : > { %p519_p5 = pneg %p518_p2 }
 0x138   : > { %p525_p6 = por %p524_p4, %p523_p11 }
 0x13a   : > { %p526_p8 = pnand %p525_p6, %p519_p5 }
 0x13c   : > { %529 = shalt.err (!%p526_p8)
}
 0x13d   : > { %388 = dma.vmem_to_hbm [thread:$0]  (%p692_p12), %s759_s5, 128, %s757_s10, %s264_s11  }
 0x13e PF: > { %s289_s20 = sand.u32 1, %s560_s12   ;;  %p819_p10 = scmp.ne.s32.totalorder %s809_s19, 0 }
 0x13f   : > { %p820_p13 = scmp.ge.s32.totalorder %s572_s15, 2  ;;  %s290_s4 = scalar_lea.sflag [#allocation4], %s289_s20 }
 0x141   : > { %p399_p3 = pnand %p820_p13, %p819_p10 }
 0x143   : > { %555 = dma.done.wait (!%p399_p3), %s290_s4, 128  }
 0x144   : > { %557 = vsyncadd (!%p399_p3), %s290_s4, 4294967168  ;;  %p17_p7 = scmp.ge.s32.totalorder %s657_s24, 4   ;;  %s821_s12 = smov %s564_s13 }
 0x145   : > { %s822_s13 = smov %s568_s14  ;;  %s823_s14 = smov %s688_s17 }
 0x146   : > { %s824_s15 = smov %s657_s24  ;;  %19 = sbr.rel (!%p17_p7) target bundleno = 6 (0x6), region = 81 }
 0x14d   :  { %295 = vsyncpa [#allocation3], 1 }
 0x14e   :  { %297 = vsyncpa [#allocation3 + $0x1], 1 }
 0x14f   :  { %298 = vsyncpa [#allocation6], 1 }
 0x150   :  { %299 = vsyncpa [#allocation4], 1 }
 0x151   :  { %301 = vsyncpa [#allocation4 + $0x1], 1 }

</bundles_post_ra>
